<compile_context>
chip_gen: v5e
topology: v5e:2x2
jax: 0.10.0
libtpu: 0.0.40
codegen_flags: <defaults>
</compile_context>

<pallas_src>
import jax
import jax.numpy as jnp
from jax.experimental import pallas as pl
from jax.experimental.pallas import tpu as pltpu


def _east_loss_kernel(score_ref, pred_score_ref, geo_ref, pred_geo_ref,
                      edge_ref, out_ref,
                      acc_sp, acc_ss, acc_gnum, acc_gcnt):
    # grid = (spatial_split, batch, spatial_tile); reduction axis is last.
    s = pl.program_id(2)
    n_s = pl.num_programs(2)
    C = geo_ref.shape[1]

    # ---- per-(split, batch) accumulator init on the first spatial tile ----
    @pl.when(s == 0)
    def _():
        acc_sp[...] = jnp.zeros_like(acc_sp)
        acc_ss[...] = jnp.zeros_like(acc_ss)
        acc_gnum[...] = jnp.zeros_like(acc_gnum)
        acc_gcnt[...] = jnp.zeros_like(acc_gcnt)

    score = score_ref[0].astype(jnp.float32)          # (tr, 128)
    pred_score = pred_score_ref[0].astype(jnp.float32)
    edge = edge_ref[0].astype(jnp.float32)

    # ---- dice partial sums (only sum(s*p) and sum(s)+sum(p) are needed) ----
    acc_sp[...] += jnp.sum(score * pred_score, axis=0, keepdims=True)
    acc_ss[...] += jnp.sum(score + pred_score, axis=0, keepdims=True)

    # ---- smoothed-L1 over the 8 quad deltas, channel-by-channel so only one
    # tile-sized temporary stays live ----
    sl1_sum = jnp.zeros_like(score)
    for c in range(C):
        d = geo_ref[0, c].astype(jnp.float32) - pred_geo_ref[0, c].astype(jnp.float32)
        ad = jnp.abs(d)
        sl1_sum = sl1_sum + jnp.where(ad < 1.0, 0.5 * d * d, ad - 0.5)

    # Mask-based equivalent of score.nonzero() gather in the PyTorch module.
    # Padded / off-mask pixels may have edge == 0 (div -> inf/nan); jnp.where
    # is a true lane select so those lanes are discarded — do not refactor into
    # a multiply-by-mask form.
    mask = score != 0.0
    pix = jnp.where(mask, sl1_sum / (8.0 * edge), 0.0)
    acc_gnum[...] += jnp.sum(pix, axis=0, keepdims=True)
    acc_gcnt[...] += jnp.sum(mask.astype(jnp.float32), axis=0, keepdims=True)

    # ---- on the last spatial tile, emit the four raw lane-wise partials as a
    # lane-dense (8,128) block; the nonlinear finalization happens in JAX so
    # partials from the two spatial splits can be combined correctly ----
    @pl.when(s == n_s - 1)
    def _():
        out_ref[...] = jnp.concatenate(
            [acc_sp[...], acc_ss[...], acc_gnum[...], acc_gcnt[...],
             jnp.zeros((4, 128), jnp.float32)], axis=0)[None, None]


def _round_up(x, m):
    return -(-x // m) * m


def _spatial_layout(H, W, target_tile_rows=512, n_splits=2):
    """Lane-dense spatial layout.

    Flattens H*W into `rows` of 128 lanes, then pads `rows` up to a multiple of
    n_splits * tile_rows. Never degenerates to 8-row or full-extent tiles.
    Returns (rows_padded, element_pad, tile_rows, tiles_per_split).
    """
    n = H * W
    rows = -(-n // 128)                                   # ceil(n / 128)
    tr = min(target_tile_rows, _round_up(-(-rows // n_splits), 8))
    tr = max(8, _round_up(tr, 8))
    tiles_per_split = -(-rows // (n_splits * tr))
    rows_padded = n_splits * tiles_per_split * tr
    pad = rows_padded * 128 - n
    return rows_padded, pad, tr, tiles_per_split


def east_loss(score, pred_score, geo, pred_geo, edge,
              *, target_tile_rows=512, n_splits=2,
              vmem_limit_bytes=48 * 1024 * 1024):
    B, H, W = score.shape
    C = geo.shape[1]
    assert geo.shape == (B, C, H, W) and pred_geo.shape == (B, C, H, W)
    assert pred_score.shape == (B, H, W) and edge.shape == (B, H, W)

    n = H * W
    rows_padded, pad, tr, tiles_per_split = _spatial_layout(
        H, W, target_tile_rows=target_tile_rows, n_splits=n_splits)

    def to_lane_dense(x):
        # dtype-preserving (bf16 stays bf16; the kernel casts per-tile).
        x = x.reshape(x.shape[:-2] + (n,))
        if pad:
            # Single fused pad pass (lane pad + row pad together). Zero padding
            # is neutral: 0-score pixels contribute 0 to every partial.
            widths = [(0, 0)] * (x.ndim - 1) + [(0, pad)]
            x = jnp.pad(x, widths)
        # When pad == 0 this is a free metadata reshape (no HBM pass).
        return x.reshape(x.shape[:-1] + (rows_padded, 128))

    score_ld = to_lane_dense(score)                # (B, rows_padded, 128)
    pred_score_ld = to_lane_dense(pred_score)
    edge_ld = to_lane_dense(edge)
    geo_ld = to_lane_dense(geo)                    # (B, C, rows_padded, 128)
    pred_geo_ld = to_lane_dense(pred_geo)

    n_pad = rows_padded * 128
    bytes_in = B * n_pad * (
        score_ld.dtype.itemsize + pred_score_ld.dtype.itemsize
        + edge_ld.dtype.itemsize
        + C * (geo_ld.dtype.itemsize + pred_geo_ld.dtype.itemsize))
    cost = pl.CostEstimate(
        flops=int((10 + 8 * C) * B * n_pad),
        transcendentals=0,
        bytes_accessed=int(bytes_in + n_splits * B * 8 * 128 * 4),
    )

    spatial_idx = lambda p, s: p * tiles_per_split + s

    out = pl.pallas_call(
        _east_loss_kernel,
        out_shape=jax.ShapeDtypeStruct((n_splits, B, 8, 128), jnp.float32),
        grid_spec=pltpu.PrefetchScalarGridSpec(
            num_scalar_prefetch=0,
            grid=(n_splits, B, tiles_per_split),
            in_specs=[
                pl.BlockSpec((1, tr, 128),                                  # score
                             lambda p, b, s: (b, spatial_idx(p, s), 0)),
                pl.BlockSpec((1, tr, 128),                                  # pred_score
                             lambda p, b, s: (b, spatial_idx(p, s), 0)),
                pl.BlockSpec((1, C, tr, 128),                               # geo
                             lambda p, b, s: (b, 0, spatial_idx(p, s), 0)),
                pl.BlockSpec((1, C, tr, 128),                               # pred_geo
                             lambda p, b, s: (b, 0, spatial_idx(p, s), 0)),
                pl.BlockSpec((1, tr, 128),                                  # edge
                             lambda p, b, s: (b, spatial_idx(p, s), 0)),
            ],
            out_specs=pl.BlockSpec((1, 1, 8, 128), lambda p, b, s: (p, b, 0, 0)),
            scratch_shapes=[pltpu.VMEM((1, 128), jnp.float32)] * 4,
        ),
        compiler_params=pltpu.CompilerParams(
            dimension_semantics=("parallel", "parallel", "arbitrary"),
            vmem_limit_bytes=vmem_limit_bytes),
        cost_estimate=cost,
    )(score_ld, pred_score_ld, geo_ld, pred_geo_ld, edge_ld)

    # ---- tiny finalization in JAX: combine the spatial splits + lanes, then
    # the nonlinear per-batch dice / geo terms, then the mean over B ----
    parts = jnp.sum(out, axis=(0, 3))              # (B, 8): splits + lanes summed
    sp_sum = parts[:, 0]
    ss_sum = parts[:, 1]
    geo_num = parts[:, 2]
    geo_cnt = parts[:, 3]
    dice = 1.0 - 2.0 * sp_sum / ss_sum
    # NOTE: geo_cnt == 0 (all-zero score map) yields NaN, matching the PyTorch
    # mean-over-empty-nonzero behaviour. No eps guard by design.
    geo_term = geo_num / geo_cnt
    # forward(): score_loss/B + geo_loss/B == sum_b(dice_b + geo_b) / B
    return jnp.sum(dice + geo_term) / B


def east_loss_ref(score, pred_score, geo, pred_geo, edge):
    """Pure-JAX reference mirroring the PyTorch forward (batched branch)."""
    B = score.shape[0]
    score_f = score.astype(jnp.float32)
    pred_f = pred_score.astype(jnp.float32)
    geo_f = geo.astype(jnp.float32)
    pred_geo_f = pred_geo.astype(jnp.float32)
    edge_f = edge.astype(jnp.float32)
    score_loss = 0.0
    geo_loss = 0.0
    for b in range(B):
        s = score_f[b]
        ps = pred_f[b]
        score_loss += 1.0 - 2.0 * jnp.sum(s * ps) / (jnp.sum(s) + jnp.sum(ps))
        mask = s != 0
        diff = geo_f[b] - pred_geo_f[b]
        ad = jnp.abs(diff)
        sl1 = jnp.where(ad < 1.0, 0.5 * diff * diff, ad - 0.5)
        pix = jnp.sum(sl1, axis=0) / (8.0 * edge_f[b])
        geo_loss += jnp.sum(jnp.where(mask, pix, 0.0)) / jnp.sum(mask)
    return score_loss / B + geo_loss / B


if __name__ == "__main__":
    # TODO(synk): the 2-D (unbatched) branch of forward calls quad_geo_loss
    # without `edge` (a bug in the original module); only the batched path is
    # implemented here.
    B, C, H, W = 2, 8, 16, 16
    key = jax.random.PRNGKey(0)
    k1, k2, k3, k4, k5 = jax.random.split(key, 5)

    score = jax.random.bernoulli(k1, p=0.3, shape=(B, H, W)).astype(jnp.float32)
    pred_score = jax.nn.sigmoid(jax.random.normal(k2, (B, H, W))).astype(jnp.float32)
    geo = jax.random.normal(k3, (B, C, H, W), dtype=jnp.float32) * 2.0
    pred_geo = jax.random.normal(k4, (B, C, H, W), dtype=jnp.float32) * 2.0
    edge = jax.random.uniform(k5, (B, H, W), minval=0.5, maxval=1.5,
                              dtype=jnp.float32)

    out = jax.block_until_ready(east_loss(score, pred_score, geo, pred_geo, edge))
    ref = jax.block_until_ready(east_loss_ref(score, pred_score, geo, pred_geo, edge))

    assert jnp.isfinite(out), f"non-finite kernel output: {out}"
    assert jnp.allclose(out, ref, rtol=1e-4, atol=1e-5), f"mismatch: {out} vs {ref}"

    # bf16 smoke test: the wrapper no longer upcasts, so HBM traffic is halved.
    out_bf16 = jax.block_until_ready(east_loss(
        score.astype(jnp.bfloat16), pred_score.astype(jnp.bfloat16),
        geo.astype(jnp.bfloat16), pred_geo.astype(jnp.bfloat16),
        edge.astype(jnp.bfloat16)))
    assert jnp.isfinite(out_bf16), f"non-finite bf16 kernel output: {out_bf16}"

    print("KERNEL_OK")
</pallas_src>

<mosaic_0001>
module attributes {stable_mosaic.version = 11 : i64} {
  func.func @_east_loss_kernel(%arg0: i32, %arg1: i32, %arg2: i32, %arg3: memref<1x8x128xf32, #tpu.memory_space<vmem>>, %arg4: memref<1x8x128xf32, #tpu.memory_space<vmem>>, %arg5: memref<1x8x8x128xf32, #tpu.memory_space<vmem>>, %arg6: memref<1x8x8x128xf32, #tpu.memory_space<vmem>>, %arg7: memref<1x8x128xf32, #tpu.memory_space<vmem>>, %arg8: memref<1x1x8x128xf32, #tpu.memory_space<vmem>>, %arg9: memref<1x128xf32, #tpu.memory_space<vmem>>, %arg10: memref<1x128xf32, #tpu.memory_space<vmem>>, %arg11: memref<1x128xf32, #tpu.memory_space<vmem>>, %arg12: memref<1x128xf32, #tpu.memory_space<vmem>>) attributes {dimension_semantics = [#tpu.dimension_semantics<parallel>, #tpu.dimension_semantics<parallel>, #tpu.dimension_semantics<arbitrary>], iteration_bounds = array<i64: 2, 2, 1>, scalar_prefetch = 0 : i64, scratch_operands = 4 : i64, tpu.core_type = #tpu.core_type<tc>, window_params = [{transform_indices = @transform_0, window_bounds = array<i64: 1, 8, 128>}, {transform_indices = @transform_1, window_bounds = array<i64: 1, 8, 128>}, {transform_indices = @transform_2, window_bounds = array<i64: 1, 8, 8, 128>}, {transform_indices = @transform_3, window_bounds = array<i64: 1, 8, 8, 128>}, {transform_indices = @transform_4, window_bounds = array<i64: 1, 8, 128>}, {transform_indices = @transform_5, window_bounds = array<i64: 1, 1, 8, 128>}]} {
    %c0_i32 = arith.constant 0 : i32
    %0 = arith.cmpi eq, %arg2, %c0_i32 : i32
    %1 = arith.extui %0 : i1 to i32
    %c0_i32_0 = arith.constant 0 : i32
    %2 = arith.cmpi ne, %1, %c0_i32_0 : i32
    scf.if %2 {
      %cst_115 = arith.constant 0.000000e+00 : f32
      %164 = vector.broadcast %cst_115 : f32 to vector<1x128xf32>
      %c0_116 = arith.constant 0 : index
      %c0_117 = arith.constant 0 : index
      %165 = vector.load %arg9[%c0_116, %c0_117] : memref<1x128xf32, #tpu.memory_space<vmem>>, vector<1x128xf32>
      tpu.vector_store %arg9[%c0_116, %c0_117], %164 {strides = array<i32>} : memref<1x128xf32, #tpu.memory_space<vmem>>, vector<1x128xf32>,
      %cst_118 = arith.constant 0.000000e+00 : f32
      %166 = vector.broadcast %cst_118 : f32 to vector<1x128xf32>
      %c0_119 = arith.constant 0 : index
      %c0_120 = arith.constant 0 : index
      %167 = vector.load %arg10[%c0_119, %c0_120] : memref<1x128xf32, #tpu.memory_space<vmem>>, vector<1x128xf32>
      tpu.vector_store %arg10[%c0_119, %c0_120], %166 {strides = array<i32>} : memref<1x128xf32, #tpu.memory_space<vmem>>, vector<1x128xf32>,
      %cst_121 = arith.constant 0.000000e+00 : f32
      %168 = vector.broadcast %cst_121 : f32 to vector<1x128xf32>
      %c0_122 = arith.constant 0 : index
      %c0_123 = arith.constant 0 : index
      %169 = vector.load %arg11[%c0_122, %c0_123] : memref<1x128xf32, #tpu.memory_space<vmem>>, vector<1x128xf32>
      tpu.vector_store %arg11[%c0_122, %c0_123], %168 {strides = array<i32>} : memref<1x128xf32, #tpu.memory_space<vmem>>, vector<1x128xf32>,
      %cst_124 = arith.constant 0.000000e+00 : f32
      %170 = vector.broadcast %cst_124 : f32 to vector<1x128xf32>
      %c0_125 = arith.constant 0 : index
      %c0_126 = arith.constant 0 : index
      %171 = vector.load %arg12[%c0_125, %c0_126] : memref<1x128xf32, #tpu.memory_space<vmem>>, vector<1x128xf32>
      tpu.vector_store %arg12[%c0_125, %c0_126], %170 {strides = array<i32>} : memref<1x128xf32, #tpu.memory_space<vmem>>, vector<1x128xf32>,
    } else {
    }
    %c0 = arith.constant 0 : index
    %c0_1 = arith.constant 0 : index
    %c0_2 = arith.constant 0 : index
    %3 = vector.load %arg3[%c0, %c0_1, %c0_2] : memref<1x8x128xf32, #tpu.memory_space<vmem>>, vector<1x8x128xf32>
    %4 = vector.shape_cast %3 : vector<1x8x128xf32> to vector<8x128xf32>
    %c0_3 = arith.constant 0 : index
    %c0_4 = arith.constant 0 : index
    %c0_5 = arith.constant 0 : index
    %5 = vector.load %arg4[%c0_3, %c0_4, %c0_5] : memref<1x8x128xf32, #tpu.memory_space<vmem>>, vector<1x8x128xf32>
    %6 = vector.shape_cast %5 : vector<1x8x128xf32> to vector<8x128xf32>
    %c0_6 = arith.constant 0 : index
    %c0_7 = arith.constant 0 : index
    %c0_8 = arith.constant 0 : index
    %7 = vector.load %arg7[%c0_6, %c0_7, %c0_8] : memref<1x8x128xf32, #tpu.memory_space<vmem>>, vector<1x8x128xf32>
    %8 = vector.shape_cast %7 : vector<1x8x128xf32> to vector<8x128xf32>
    %c0_9 = arith.constant 0 : index
    %c0_10 = arith.constant 0 : index
    %9 = vector.load %arg9[%c0_9, %c0_10] : memref<1x128xf32, #tpu.memory_space<vmem>>, vector<1x128xf32>
    %10 = arith.mulf %4, %6 : vector<8x128xf32>
    %cst = arith.constant dense<0.000000e+00> : vector<128xf32>
    %11 = vector.multi_reduction <add>, %10, %cst [0] : vector<8x128xf32> to vector<128xf32>
    %12 = vector.shape_cast %11 : vector<128xf32> to vector<1x128xf32>
    %13 = arith.addf %9, %12 : vector<1x128xf32>
    %c0_11 = arith.constant 0 : index
    %c0_12 = arith.constant 0 : index
    %14 = vector.load %arg9[%c0_11, %c0_12] : memref<1x128xf32, #tpu.memory_space<vmem>>, vector<1x128xf32>
    tpu.vector_store %arg9[%c0_11, %c0_12], %13 {strides = array<i32>} : memref<1x128xf32, #tpu.memory_space<vmem>>, vector<1x128xf32>,
    %c0_13 = arith.constant 0 : index
    %c0_14 = arith.constant 0 : index
    %15 = vector.load %arg10[%c0_13, %c0_14] : memref<1x128xf32, #tpu.memory_space<vmem>>, vector<1x128xf32>
    %16 = arith.addf %4, %6 : vector<8x128xf32>
    %cst_15 = arith.constant dense<0.000000e+00> : vector<128xf32>
    %17 = vector.multi_reduction <add>, %16, %cst_15 [0] : vector<8x128xf32> to vector<128xf32>
    %18 = vector.shape_cast %17 : vector<128xf32> to vector<1x128xf32>
    %19 = arith.addf %15, %18 : vector<1x128xf32>
    %c0_16 = arith.constant 0 : index
    %c0_17 = arith.constant 0 : index
    %20 = vector.load %arg10[%c0_16, %c0_17] : memref<1x128xf32, #tpu.memory_space<vmem>>, vector<1x128xf32>
    tpu.vector_store %arg10[%c0_16, %c0_17], %19 {strides = array<i32>} : memref<1x128xf32, #tpu.memory_space<vmem>>, vector<1x128xf32>,
    %cst_18 = arith.constant 0.000000e+00 : f32
    %21 = vector.broadcast %cst_18 : f32 to vector<8x128xf32>
    %c0_19 = arith.constant 0 : index
    %c0_20 = arith.constant 0 : index
    %c0_21 = arith.constant 0 : index
    %c0_22 = arith.constant 0 : index
    %22 = vector.load %arg5[%c0_19, %c0_20, %c0_21, %c0_22] : memref<1x8x8x128xf32, #tpu.memory_space<vmem>>, vector<1x1x8x128xf32>
    %23 = vector.shape_cast %22 : vector<1x1x8x128xf32> to vector<8x128xf32>
    %c0_23 = arith.constant 0 : index
    %c0_24 = arith.constant 0 : index
    %c0_25 = arith.constant 0 : index
    %c0_26 = arith.constant 0 : index
    %24 = vector.load %arg6[%c0_23, %c0_24, %c0_25, %c0_26] : memref<1x8x8x128xf32, #tpu.memory_space<vmem>>, vector<1x1x8x128xf32>
    %25 = vector.shape_cast %24 : vector<1x1x8x128xf32> to vector<8x128xf32>
    %26 = arith.subf %23, %25 : vector<8x128xf32>
    %27 = math.absf %26 : vector<8x128xf32>
    %cst_27 = arith.constant 1.000000e+00 : f32
    %28 = vector.broadcast %cst_27 : f32 to vector<8x128xf32>
    %29 = arith.cmpf olt, %27, %28 : vector<8x128xf32>
    %cst_28 = arith.constant 5.000000e-01 : f32
    %30 = vector.broadcast %cst_28 : f32 to vector<8x128xf32>
    %31 = arith.mulf %30, %26 : vector<8x128xf32>
    %32 = arith.mulf %31, %26 : vector<8x128xf32>
    %cst_29 = arith.constant 5.000000e-01 : f32
    %33 = vector.broadcast %cst_29 : f32 to vector<8x128xf32>
    %34 = arith.subf %27, %33 : vector<8x128xf32>
    %35 = arith.select %29, %32, %34 : vector<8x128xi1>, vector<8x128xf32>
    %36 = arith.addf %21, %35 : vector<8x128xf32>
    %c0_30 = arith.constant 0 : index
    %c1 = arith.constant 1 : index
    %c0_31 = arith.constant 0 : index
    %c0_32 = arith.constant 0 : index
    %37 = vector.load %arg5[%c0_30, %c1, %c0_31, %c0_32] : memref<1x8x8x128xf32, #tpu.memory_space<vmem>>, vector<1x1x8x128xf32>
    %38 = vector.shape_cast %37 : vector<1x1x8x128xf32> to vector<8x128xf32>
    %c0_33 = arith.constant 0 : index
    %c1_34 = arith.constant 1 : index
    %c0_35 = arith.constant 0 : index
    %c0_36 = arith.constant 0 : index
    %39 = vector.load %arg6[%c0_33, %c1_34, %c0_35, %c0_36] : memref<1x8x8x128xf32, #tpu.memory_space<vmem>>, vector<1x1x8x128xf32>
    %40 = vector.shape_cast %39 : vector<1x1x8x128xf32> to vector<8x128xf32>
    %41 = arith.subf %38, %40 : vector<8x128xf32>
    %42 = math.absf %41 : vector<8x128xf32>
    %cst_37 = arith.constant 1.000000e+00 : f32
    %43 = vector.broadcast %cst_37 : f32 to vector<8x128xf32>
    %44 = arith.cmpf olt, %42, %43 : vector<8x128xf32>
    %cst_38 = arith.constant 5.000000e-01 : f32
    %45 = vector.broadcast %cst_38 : f32 to vector<8x128xf32>
    %46 = arith.mulf %45, %41 : vector<8x128xf32>
    %47 = arith.mulf %46, %41 : vector<8x128xf32>
    %cst_39 = arith.constant 5.000000e-01 : f32
    %48 = vector.broadcast %cst_39 : f32 to vector<8x128xf32>
    %49 = arith.subf %42, %48 : vector<8x128xf32>
    %50 = arith.select %44, %47, %49 : vector<8x128xi1>, vector<8x128xf32>
    %51 = arith.addf %36, %50 : vector<8x128xf32>
    %c0_40 = arith.constant 0 : index
    %c2 = arith.constant 2 : index
    %c0_41 = arith.constant 0 : index
    %c0_42 = arith.constant 0 : index
    %52 = vector.load %arg5[%c0_40, %c2, %c0_41, %c0_42] : memref<1x8x8x128xf32, #tpu.memory_space<vmem>>, vector<1x1x8x128xf32>
    %53 = vector.shape_cast %52 : vector<1x1x8x128xf32> to vector<8x128xf32>
    %c0_43 = arith.constant 0 : index
    %c2_44 = arith.constant 2 : index
    %c0_45 = arith.constant 0 : index
    %c0_46 = arith.constant 0 : index
    %54 = vector.load %arg6[%c0_43, %c2_44, %c0_45, %c0_46] : memref<1x8x8x128xf32, #tpu.memory_space<vmem>>, vector<1x1x8x128xf32>
    %55 = vector.shape_cast %54 : vector<1x1x8x128xf32> to vector<8x128xf32>
    %56 = arith.subf %53, %55 : vector<8x128xf32>
    %57 = math.absf %56 : vector<8x128xf32>
    %cst_47 = arith.constant 1.000000e+00 : f32
    %58 = vector.broadcast %cst_47 : f32 to vector<8x128xf32>
    %59 = arith.cmpf olt, %57, %58 : vector<8x128xf32>
    %cst_48 = arith.constant 5.000000e-01 : f32
    %60 = vector.broadcast %cst_48 : f32 to vector<8x128xf32>
    %61 = arith.mulf %60, %56 : vector<8x128xf32>
    %62 = arith.mulf %61, %56 : vector<8x128xf32>
    %cst_49 = arith.constant 5.000000e-01 : f32
    %63 = vector.broadcast %cst_49 : f32 to vector<8x128xf32>
    %64 = arith.subf %57, %63 : vector<8x128xf32>
    %65 = arith.select %59, %62, %64 : vector<8x128xi1>, vector<8x128xf32>
    %66 = arith.addf %51, %65 : vector<8x128xf32>
    %c0_50 = arith.constant 0 : index
    %c3 = arith.constant 3 : index
    %c0_51 = arith.constant 0 : index
    %c0_52 = arith.constant 0 : index
    %67 = vector.load %arg5[%c0_50, %c3, %c0_51, %c0_52] : memref<1x8x8x128xf32, #tpu.memory_space<vmem>>, vector<1x1x8x128xf32>
    %68 = vector.shape_cast %67 : vector<1x1x8x128xf32> to vector<8x128xf32>
    %c0_53 = arith.constant 0 : index
    %c3_54 = arith.constant 3 : index
    %c0_55 = arith.constant 0 : index
    %c0_56 = arith.constant 0 : index
    %69 = vector.load %arg6[%c0_53, %c3_54, %c0_55, %c0_56] : memref<1x8x8x128xf32, #tpu.memory_space<vmem>>, vector<1x1x8x128xf32>
    %70 = vector.shape_cast %69 : vector<1x1x8x128xf32> to vector<8x128xf32>
    %71 = arith.subf %68, %70 : vector<8x128xf32>
    %72 = math.absf %71 : vector<8x128xf32>
    %cst_57 = arith.constant 1.000000e+00 : f32
    %73 = vector.broadcast %cst_57 : f32 to vector<8x128xf32>
    %74 = arith.cmpf olt, %72, %73 : vector<8x128xf32>
    %cst_58 = arith.constant 5.000000e-01 : f32
    %75 = vector.broadcast %cst_58 : f32 to vector<8x128xf32>
    %76 = arith.mulf %75, %71 : vector<8x128xf32>
    %77 = arith.mulf %76, %71 : vector<8x128xf32>
    %cst_59 = arith.constant 5.000000e-01 : f32
    %78 = vector.broadcast %cst_59 : f32 to vector<8x128xf32>
    %79 = arith.subf %72, %78 : vector<8x128xf32>
    %80 = arith.select %74, %77, %79 : vector<8x128xi1>, vector<8x128xf32>
    %81 = arith.addf %66, %80 : vector<8x128xf32>
    %c0_60 = arith.constant 0 : index
    %c4 = arith.constant 4 : index
    %c0_61 = arith.constant 0 : index
    %c0_62 = arith.constant 0 : index
    %82 = vector.load %arg5[%c0_60, %c4, %c0_61, %c0_62] : memref<1x8x8x128xf32, #tpu.memory_space<vmem>>, vector<1x1x8x128xf32>
    %83 = vector.shape_cast %82 : vector<1x1x8x128xf32> to vector<8x128xf32>
    %c0_63 = arith.constant 0 : index
    %c4_64 = arith.constant 4 : index
    %c0_65 = arith.constant 0 : index
    %c0_66 = arith.constant 0 : index
    %84 = vector.load %arg6[%c0_63, %c4_64, %c0_65, %c0_66] : memref<1x8x8x128xf32, #tpu.memory_space<vmem>>, vector<1x1x8x128xf32>
    %85 = vector.shape_cast %84 : vector<1x1x8x128xf32> to vector<8x128xf32>
    %86 = arith.subf %83, %85 : vector<8x128xf32>
    %87 = math.absf %86 : vector<8x128xf32>
    %cst_67 = arith.constant 1.000000e+00 : f32
    %88 = vector.broadcast %cst_67 : f32 to vector<8x128xf32>
    %89 = arith.cmpf olt, %87, %88 : vector<8x128xf32>
    %cst_68 = arith.constant 5.000000e-01 : f32
    %90 = vector.broadcast %cst_68 : f32 to vector<8x128xf32>
    %91 = arith.mulf %90, %86 : vector<8x128xf32>
    %92 = arith.mulf %91, %86 : vector<8x128xf32>
    %cst_69 = arith.constant 5.000000e-01 : f32
    %93 = vector.broadcast %cst_69 : f32 to vector<8x128xf32>
    %94 = arith.subf %87, %93 : vector<8x128xf32>
    %95 = arith.select %89, %92, %94 : vector<8x128xi1>, vector<8x128xf32>
    %96 = arith.addf %81, %95 : vector<8x128xf32>
    %c0_70 = arith.constant 0 : index
    %c5 = arith.constant 5 : index
    %c0_71 = arith.constant 0 : index
    %c0_72 = arith.constant 0 : index
    %97 = vector.load %arg5[%c0_70, %c5, %c0_71, %c0_72] : memref<1x8x8x128xf32, #tpu.memory_space<vmem>>, vector<1x1x8x128xf32>
    %98 = vector.shape_cast %97 : vector<1x1x8x128xf32> to vector<8x128xf32>
    %c0_73 = arith.constant 0 : index
    %c5_74 = arith.constant 5 : index
    %c0_75 = arith.constant 0 : index
    %c0_76 = arith.constant 0 : index
    %99 = vector.load %arg6[%c0_73, %c5_74, %c0_75, %c0_76] : memref<1x8x8x128xf32, #tpu.memory_space<vmem>>, vector<1x1x8x128xf32>
    %100 = vector.shape_cast %99 : vector<1x1x8x128xf32> to vector<8x128xf32>
    %101 = arith.subf %98, %100 : vector<8x128xf32>
    %102 = math.absf %101 : vector<8x128xf32>
    %cst_77 = arith.constant 1.000000e+00 : f32
    %103 = vector.broadcast %cst_77 : f32 to vector<8x128xf32>
    %104 = arith.cmpf olt, %102, %103 : vector<8x128xf32>
    %cst_78 = arith.constant 5.000000e-01 : f32
    %105 = vector.broadcast %cst_78 : f32 to vector<8x128xf32>
    %106 = arith.mulf %105, %101 : vector<8x128xf32>
    %107 = arith.mulf %106, %101 : vector<8x128xf32>
    %cst_79 = arith.constant 5.000000e-01 : f32
    %108 = vector.broadcast %cst_79 : f32 to vector<8x128xf32>
    %109 = arith.subf %102, %108 : vector<8x128xf32>
    %110 = arith.select %104, %107, %109 : vector<8x128xi1>, vector<8x128xf32>
    %111 = arith.addf %96, %110 : vector<8x128xf32>
    %c0_80 = arith.constant 0 : index
    %c6 = arith.constant 6 : index
    %c0_81 = arith.constant 0 : index
    %c0_82 = arith.constant 0 : index
    %112 = vector.load %arg5[%c0_80, %c6, %c0_81, %c0_82] : memref<1x8x8x128xf32, #tpu.memory_space<vmem>>, vector<1x1x8x128xf32>
    %113 = vector.shape_cast %112 : vector<1x1x8x128xf32> to vector<8x128xf32>
    %c0_83 = arith.constant 0 : index
    %c6_84 = arith.constant 6 : index
    %c0_85 = arith.constant 0 : index
    %c0_86 = arith.constant 0 : index
    %114 = vector.load %arg6[%c0_83, %c6_84, %c0_85, %c0_86] : memref<1x8x8x128xf32, #tpu.memory_space<vmem>>, vector<1x1x8x128xf32>
    %115 = vector.shape_cast %114 : vector<1x1x8x128xf32> to vector<8x128xf32>
    %116 = arith.subf %113, %115 : vector<8x128xf32>
    %117 = math.absf %116 : vector<8x128xf32>
    %cst_87 = arith.constant 1.000000e+00 : f32
    %118 = vector.broadcast %cst_87 : f32 to vector<8x128xf32>
    %119 = arith.cmpf olt, %117, %118 : vector<8x128xf32>
    %cst_88 = arith.constant 5.000000e-01 : f32
    %120 = vector.broadcast %cst_88 : f32 to vector<8x128xf32>
    %121 = arith.mulf %120, %116 : vector<8x128xf32>
    %122 = arith.mulf %121, %116 : vector<8x128xf32>
    %cst_89 = arith.constant 5.000000e-01 : f32
    %123 = vector.broadcast %cst_89 : f32 to vector<8x128xf32>
    %124 = arith.subf %117, %123 : vector<8x128xf32>
    %125 = arith.select %119, %122, %124 : vector<8x128xi1>, vector<8x128xf32>
    %126 = arith.addf %111, %125 : vector<8x128xf32>
    %c0_90 = arith.constant 0 : index
    %c7 = arith.constant 7 : index
    %c0_91 = arith.constant 0 : index
    %c0_92 = arith.constant 0 : index
    %127 = vector.load %arg5[%c0_90, %c7, %c0_91, %c0_92] : memref<1x8x8x128xf32, #tpu.memory_space<vmem>>, vector<1x1x8x128xf32>
    %128 = vector.shape_cast %127 : vector<1x1x8x128xf32> to vector<8x128xf32>
    %c0_93 = arith.constant 0 : index
    %c7_94 = arith.constant 7 : index
    %c0_95 = arith.constant 0 : index
    %c0_96 = arith.constant 0 : index
    %129 = vector.load %arg6[%c0_93, %c7_94, %c0_95, %c0_96] : memref<1x8x8x128xf32, #tpu.memory_space<vmem>>, vector<1x1x8x128xf32>
    %130 = vector.shape_cast %129 : vector<1x1x8x128xf32> to vector<8x128xf32>
    %131 = arith.subf %128, %130 : vector<8x128xf32>
    %132 = math.absf %131 : vector<8x128xf32>
    %cst_97 = arith.constant 1.000000e+00 : f32
    %133 = vector.broadcast %cst_97 : f32 to vector<8x128xf32>
    %134 = arith.cmpf olt, %132, %133 : vector<8x128xf32>
    %cst_98 = arith.constant 5.000000e-01 : f32
    %135 = vector.broadcast %cst_98 : f32 to vector<8x128xf32>
    %136 = arith.mulf %135, %131 : vector<8x128xf32>
    %137 = arith.mulf %136, %131 : vector<8x128xf32>
    %cst_99 = arith.constant 5.000000e-01 : f32
    %138 = vector.broadcast %cst_99 : f32 to vector<8x128xf32>
    %139 = arith.subf %132, %138 : vector<8x128xf32>
    %140 = arith.select %134, %137, %139 : vector<8x128xi1>, vector<8x128xf32>
    %141 = arith.addf %126, %140 : vector<8x128xf32>
    %cst_100 = arith.constant 0.000000e+00 : f32
    %142 = vector.broadcast %cst_100 : f32 to vector<8x128xf32>
    %143 = arith.cmpf one, %4, %142 : vector<8x128xf32>
    %cst_101 = arith.constant 8.000000e+00 : f32
    %144 = vector.broadcast %cst_101 : f32 to vector<8x128xf32>
    %145 = arith.mulf %144, %8 : vector<8x128xf32>
    %146 = arith.divf %141, %145 : vector<8x128xf32>
    %cst_102 = arith.constant 0.000000e+00 : f32
    %147 = vector.broadcast %cst_102 : f32 to vector<8x128xf32>
    %148 = arith.select %143, %146, %147 : vector<8x128xi1>, vector<8x128xf32>
    %c0_103 = arith.constant 0 : index
    %c0_104 = arith.constant 0 : index
    %149 = vector.load %arg11[%c0_103, %c0_104] : memref<1x128xf32, #tpu.memory_space<vmem>>, vector<1x128xf32>
    %cst_105 = arith.constant dense<0.000000e+00> : vector<128xf32>
    %150 = vector.multi_reduction <add>, %148, %cst_105 [0] : vector<8x128xf32> to vector<128xf32>
    %151 = vector.shape_cast %150 : vector<128xf32> to vector<1x128xf32>
    %152 = arith.addf %149, %151 : vector<1x128xf32>
    %c0_106 = arith.constant 0 : index
    %c0_107 = arith.constant 0 : index
    %153 = vector.load %arg11[%c0_106, %c0_107] : memref<1x128xf32, #tpu.memory_space<vmem>>, vector<1x128xf32>
    tpu.vector_store %arg11[%c0_106, %c0_107], %152 {strides = array<i32>} : memref<1x128xf32, #tpu.memory_space<vmem>>, vector<1x128xf32>,
    %c0_108 = arith.constant 0 : index
    %c0_109 = arith.constant 0 : index
    %154 = vector.load %arg12[%c0_108, %c0_109] : memref<1x128xf32, #tpu.memory_space<vmem>>, vector<1x128xf32>
    %155 = arith.extui %143 : vector<8x128xi1> to vector<8x128xi32>
    %156 = arith.sitofp %155 : vector<8x128xi32> to vector<8x128xf32>
    %cst_110 = arith.constant dense<0.000000e+00> : vector<128xf32>
    %157 = vector.multi_reduction <add>, %156, %cst_110 [0] : vector<8x128xf32> to vector<128xf32>
    %158 = vector.shape_cast %157 : vector<128xf32> to vector<1x128xf32>
    %159 = arith.addf %154, %158 : vector<1x128xf32>
    %c0_111 = arith.constant 0 : index
    %c0_112 = arith.constant 0 : index
    %160 = vector.load %arg12[%c0_111, %c0_112] : memref<1x128xf32, #tpu.memory_space<vmem>>, vector<1x128xf32>
    tpu.vector_store %arg12[%c0_111, %c0_112], %159 {strides = array<i32>} : memref<1x128xf32, #tpu.memory_space<vmem>>, vector<1x128xf32>,
    %c0_i32_113 = arith.constant 0 : i32
    %161 = arith.cmpi eq, %arg2, %c0_i32_113 : i32
    %162 = arith.extui %161 : i1 to i32
    %c0_i32_114 = arith.constant 0 : i32
    %163 = arith.cmpi ne, %162, %c0_i32_114 : i32
    scf.if %163 {
      %c0_115 = arith.constant 0 : index
      %c0_116 = arith.constant 0 : index
      %164 = vector.load %arg9[%c0_115, %c0_116] : memref<1x128xf32, #tpu.memory_space<vmem>>, vector<1x128xf32>
      %c0_117 = arith.constant 0 : index
      %c0_118 = arith.constant 0 : index
      %165 = vector.load %arg10[%c0_117, %c0_118] : memref<1x128xf32, #tpu.memory_space<vmem>>, vector<1x128xf32>
      %c0_119 = arith.constant 0 : index
      %c0_120 = arith.constant 0 : index
      %166 = vector.load %arg11[%c0_119, %c0_120] : memref<1x128xf32, #tpu.memory_space<vmem>>, vector<1x128xf32>
      %c0_121 = arith.constant 0 : index
      %c0_122 = arith.constant 0 : index
      %167 = vector.load %arg12[%c0_121, %c0_122] : memref<1x128xf32, #tpu.memory_space<vmem>>, vector<1x128xf32>
      %cst_123 = arith.constant 0.000000e+00 : f32
      %168 = vector.broadcast %cst_123 : f32 to vector<4x128xf32>
      %169 = tpu.concatenate %164, %165, %166, %167, %168 in 0 : vector<1x128xf32>, vector<1x128xf32>, vector<1x128xf32>, vector<1x128xf32>, vector<4x128xf32> -> vector<8x128xf32>
      %170 = vector.shape_cast %169 : vector<8x128xf32> to vector<1x1x8x128xf32>
      %c0_124 = arith.constant 0 : index
      %c0_125 = arith.constant 0 : index
      %c0_126 = arith.constant 0 : index
      %c0_127 = arith.constant 0 : index
      %171 = vector.load %arg8[%c0_124, %c0_125, %c0_126, %c0_127] : memref<1x1x8x128xf32, #tpu.memory_space<vmem>>, vector<1x1x8x128xf32>
      tpu.vector_store %arg8[%c0_124, %c0_125, %c0_126, %c0_127], %170 {strides = array<i32>} : memref<1x1x8x128xf32, #tpu.memory_space<vmem>>, vector<1x1x8x128xf32>,
    } else {
    }
    return
  }
  func.func @transform_0(%arg0: i32, %arg1: i32, %arg2: i32) -> (i32, i32, i32) {
    %c1_i32 = arith.constant 1 : i32
    %0 = arith.muli %arg0, %c1_i32 : i32
    %1 = arith.addi %0, %arg2 : i32
    %c0_i32 = arith.constant 0 : i32
    %c0_i32_0 = arith.constant 0 : i32
    return %arg1, %1, %c0_i32 : i32, i32, i32
  }
  func.func @transform_1(%arg0: i32, %arg1: i32, %arg2: i32) -> (i32, i32, i32) {
    %c1_i32 = arith.constant 1 : i32
    %0 = arith.muli %arg0, %c1_i32 : i32
    %1 = arith.addi %0, %arg2 : i32
    %c0_i32 = arith.constant 0 : i32
    %c0_i32_0 = arith.constant 0 : i32
    return %arg1, %1, %c0_i32 : i32, i32, i32
  }
  func.func @transform_2(%arg0: i32, %arg1: i32, %arg2: i32) -> (i32, i32, i32, i32) {
    %c1_i32 = arith.constant 1 : i32
    %0 = arith.muli %arg0, %c1_i32 : i32
    %1 = arith.addi %0, %arg2 : i32
    %c0_i32 = arith.constant 0 : i32
    %c0_i32_0 = arith.constant 0 : i32
    %c0_i32_1 = arith.constant 0 : i32
    return %arg1, %c0_i32, %1, %c0_i32_0 : i32, i32, i32, i32
  }
  func.func @transform_3(%arg0: i32, %arg1: i32, %arg2: i32) -> (i32, i32, i32, i32) {
    %c1_i32 = arith.constant 1 : i32
    %0 = arith.muli %arg0, %c1_i32 : i32
    %1 = arith.addi %0, %arg2 : i32
    %c0_i32 = arith.constant 0 : i32
    %c0_i32_0 = arith.constant 0 : i32
    %c0_i32_1 = arith.constant 0 : i32
    return %arg1, %c0_i32, %1, %c0_i32_0 : i32, i32, i32, i32
  }
  func.func @transform_4(%arg0: i32, %arg1: i32, %arg2: i32) -> (i32, i32, i32) {
    %c1_i32 = arith.constant 1 : i32
    %0 = arith.muli %arg0, %c1_i32 : i32
    %1 = arith.addi %0, %arg2 : i32
    %c0_i32 = arith.constant 0 : i32
    %c0_i32_0 = arith.constant 0 : i32
    return %arg1, %1, %c0_i32 : i32, i32, i32
  }
  func.func @transform_5(%arg0: i32, %arg1: i32, %arg2: i32) -> (i32, i32, i32, i32) {
    %c0_i32 = arith.constant 0 : i32
    %c0_i32_0 = arith.constant 0 : i32
    %c0_i32_1 = arith.constant 0 : i32
    return %arg0, %arg1, %c0_i32, %c0_i32_0 : i32, i32, i32, i32
  }
}

</mosaic_0001>

<bundles_post_ra>
// kernel: tpu_custom_call.1
= control target key start
LH: loop header
LB: loop body
LE: loop exit
PB: predicated region body
PF: predicated region fallthrough
CT: control target
= control target key end

     0   :  { %s1611_s0 = inlined_call_operand.hbm [shape: f32[2,16,128], index: 0, kind: input, shape index: {}]   ;;  %s1612_s1 = inlined_call_operand.hbm [shape: f32[2,16,128], index: 1, kind: input, shape index: {}]   ;;  %s1613_s2 = inlined_call_operand.hbm [shape: f32[2,8,16,128], index: 2, kind: input, shape index: {}]   ;;  %s1614_s3 = inlined_call_operand.hbm [shape: f32[2,8,16,128], index: 3, kind: input, shape index: {}]   ;;  %s1615_s4 = inlined_call_operand.hbm [shape: f32[2,16,128], index: 4, kind: input, shape index: {}]   ;;  %s1616_s5 = inlined_call_operand.hbm [shape: f32[2,2,8,128], index: 5, kind: output, shape index: {}]  }
   0x1   :  { %1629 = sst [smem:[#allocation31_spill]] %s1612_s1 }
   0x2   :  { %1630 = sst [smem:[#allocation32_spill]] %s1613_s2 }
   0x3   :  { %1631 = sst [smem:[#allocation33_spill]] %s1614_s3 }
   0x4   :  { %1632 = sst [smem:[#allocation34_spill]] %s1616_s5 }
   0x5   :  { %10 = vsyncpa [#allocation7], 0 }
   0x6   :  { %12 = vsyncpa [#allocation7 + $0x1], 0 }
   0x7   :  { %13 = vsyncpa [#allocation10], 0 }
   0x8   :  { %15 = vsyncpa [#allocation10 + $0x1], 0 }
   0x9   :  { %16 = vsyncpa [#allocation13], 0 }
   0xa   :  { %18 = vsyncpa [#allocation13 + $0x1], 0 }
   0xb   :  { %19 = vsyncpa [#allocation8], 0 }
   0xc   :  { %21 = vsyncpa [#allocation8 + $0x1], 0  ;;  %s1303_s18 = smov 0   ;;  %s1305_s19 = smov 0  }
   0xd   :  { %s1307_s20 = smov 0   ;;  %s1309_s21 = smov 0  }
   0xe   :  { %s1311_s22 = smov 0   ;;  %s1313_s23 = smov 0  }
   0xf   :  { %s1315_s24 = smov 0   ;;  %s1317_s25 = smov 0  }
  0x10 LB: > { %1633 = sst [smem:[#allocation20_spill]] %s1239_s18  ;;  %s1344_s26 = sadd.s32 4294967295, %s1267_s25   ;;  %s1267_s25 = sphi %s1317_s25, %s27_s25   ;;  %s1263_s24 = sphi %s1315_s24, %s1676_s24   ;;  %s1259_s23 = sphi %s1313_s23, %s1675_s23   ;;  %s1255_s22 = sphi %s1311_s22, %s1674_s22   ;;  %s1251_s21 = sphi %s1309_s21, %s1673_s21   ;;  %s1247_s20 = sphi %s1307_s20, %s1672_s20   ;;  %s1243_s19 = sphi %s1305_s19, %s1678_s19   ;;  %s1239_s18 = sphi %s1303_s18, %s1677_s18  }
  0x11   : > { %1634 = sst [smem:[#allocation21_spill]] %s1247_s20  ;;  %s851_s27 = sadd.s32 4294967294, %s1267_s25  }
  0x12   : > { %1635 = sst [smem:[#allocation22_spill]] %s1251_s21  ;;  %s42_s28 = sadd.s32 1, %s1259_s23 }
  0x13   : > { %1636 = sst [smem:[#allocation23_spill]] %s1259_s23  ;;  %s46_s29 = sadd.s32 1, %s1263_s24 }
  0x14   : > { %1637 = sst [smem:[#allocation24_spill]] %s1263_s24  ;;  %p44_p0 = scmp.ge.s32.totalorder %s42_s28, 2 }
  0x15   : > { %1638 = sst [smem:[#allocation25_spill]] %s1267_s25  ;;  %s57_s30 = sadd.s32 1, %s1247_s20 }
  0x16   : > { %p64_p1 = scmp.ne.s32.totalorder %s1247_s20, %s1243_s19  ;;  %p65_p2 = scmp.eq.s32.totalorder %s1267_s25, 0 }
  0x17   : > { %s1680_s28 = smov (%p44_p0, %s42_s28), 0  ;;  %s1682_s29 = smov (!%p44_p0, %s46_s29), %s1263_s24 }
  0x18   : > { %1639 = sst [smem:[#allocation26_spill]] %s1680_s28  ;;  %s52_s6 = ssub.s32 %s1259_s23, %s1680_s28 }
  0x19   : > { %p1358_p3 = por %p65_p2, %p64_p1  ;;  %p48_p4 = scmp.ge.s32.totalorder %s1682_s29, 2 }
  0x1a   : > { %p70_p5 = scmp.ne.s32.totalorder %s1243_s19, %s1239_s18  ;;  %p71_p6 = scmp.eq.s32.totalorder %s1344_s26, 0 }
  0x1b   : > { %p216_p7 = scmp.eq.s32.totalorder %s1344_s26, 3  ;;  %s1684_s29 = smov (%p48_p4, %s1682_s29), 0 }
  0x1c   : > { %1641 = sst [smem:[#allocation27_spill]] %s1684_s29  ;;  %p1368_p8 = por %p71_p6, %p70_p5 }
  0x1d   : > { %p1372_p9 = por %p216_p7, %p64_p1  ;;  %s53_s10 = ssub.s32 %s1263_s24, %s1684_s29 }
  0x1e   : > { %p222_p10 = scmp.eq.s32.totalorder %s851_s27, 3  ;;  %s54_s11 = sor.u32 %s53_s10, %s52_s6 }
  0x1f   : > { %s1643_s9 = scalar_select %p1372_p9, 1, 0 }
  0x20   : > { %p55_p11 = scmp.eq.s32.totalorder %s54_s11, 0  ;;  %p1378_p12 = por %p222_p10, %p70_p5 }
  0x21   : > { %1644 = sst [smem:[#allocation28_spill]] %s1643_s9  ;;  %p936_p13 = scmp.lt.s32.totalorder %s1267_s25, 4 }
  0x22   : > { %s1645_s12 = scalar_select %p1378_p12, 1, 0 }
  0x23   : > { %s1384_s13 = sand.u32 1, %s1247_s20   ;;  %s855_s16 = sshll.u32 %s1259_s23, 1 }
  0x24   : > { %1646 = sst [smem:[#allocation29_spill]] %s1645_s12  ;;  %s1390_s15 = sshll.u32 %s1384_s13, 3 }
  0x25   : > { %s1387_s14 = scalar_select %p55_p11, %s1247_s20, %s57_s30  }
  0x26   : > { %s251_s17 = sadd.s32 %s1263_s24, %s855_s16  ;;  %p1396_p0 = pnand %p936_p13, %p1358_p3 }
  0x27   : > { %1647 = sst [smem:[#allocation30_spill]] %s1387_s14  ;;  %s1400_s6 = sshll.u32 %s251_s17, 3 }
  0x28   : > { %s264_s10 = sand.u32 1, %s1267_s25   ;;  %s1649_s1 = sld [smem:[#allocation31_spill]] }
  0x29   : > { %s268_s14 = scalar_lea.vmem [#allocation9], %s1390_s15  ;;  %s1408_s7 = scalar_lea.sflag [#allocation10], %s264_s10 }
  0x2a   : > { %s279_s16 = sshll.u32 %s268_s14, 4  ;;  %s860_s17 = sshll.u32 %s1384_s13, 6  ;;  %s280_s16 = int_to_ptr.vmem [resolvable:$true] %s279_s16 }
  0x2b   : > { %s290_s20 = scalar_lea.vmem [#allocation11], %s860_s17  ;;  %p869_p1 = scmp.ge.s32.totalorder %s1267_s25, 1 }
  0x2c   : > { %s300_s12 = sshll.u32 %s290_s20, 4  ;;  %p354_p2 = scmp.lt.s32.totalorder %s1267_s25, 5  ;;  %s1415_s12 = int_to_ptr.vmem [resolvable:$true] %s300_s12 }
  0x2d   : > { %s861_s30 = sshll.u32 %s1259_s23, 4  ;;  %s1651_s2 = sld [smem:[#allocation32_spill]] }
  0x2e   : > { %s275_s29 = scalar_lea.hbm %s1649_s1, %s1400_s6  ;;  %p1419_p3 = pnand %p869_p1, %p354_p2 }
  0x2f   : > { %s277_s28 = sshll.u32 %s275_s29, 4  ;;  %s295_s29 = sadd.s32 %s1263_s24, %s861_s30  ;;  %s278_s28 = int_to_ptr.hbm [resolvable:$true] %s277_s28 }
  0x30   : > { %922 = dma.hbm_to_vmem [thread:$0]  (!%p1396_p0), %s278_s28, 128, %s280_s16, %s1408_s7  }
  0x31   : > { %s862_s14 = sshll.u32 %s295_s29, 3  ;;  %s1652_s3 = sld [smem:[#allocation33_spill]] }
  0x32   : > { %s314_s25 = scalar_lea.vmem [#allocation12], %s860_s17  ;;  %s311_s1 = scalar_lea.sflag [#allocation13], %s264_s10 }
  0x33   : > { %s297_s28 = scalar_lea.hbm %s1651_s2, %s862_s14  ;;  %s324_s30 = sshll.u32 %s314_s25, 4  ;;  %s325_s30 = int_to_ptr.vmem [resolvable:$true] %s324_s30 }
  0x34   : > { %s298_s16 = sshll.u32 %s297_s28, 4  ;;  %s1269_s18 = smov 256   ;;  %s299_s16 = int_to_ptr.hbm [resolvable:$true] %s298_s16 }
  0x35   : > { %s1270_s29 = smov 128   ;;  %s1271_s28 = smov 8  }
  0x36   : > { %s246_s17 = scalar_lea.vmem [#allocation6], %s1390_s15  ;;  %s243_s25 = scalar_lea.sflag [#allocation7], %s1384_s13 }
  0x37   : > { %s321_s5 = scalar_lea.hbm %s1652_s3, %s862_s14  ;;  %s257_s2 = sshll.u32 %s246_s17, 4  ;;  %s258_s2 = int_to_ptr.vmem [resolvable:$true] %s257_s2 }
  0x38   : > { %s322_s23 = sshll.u32 %s321_s5, 4  ;;  %s253_s5 = scalar_lea.hbm %s1611_s0, %s1400_s6  ;;  %s323_s23 = int_to_ptr.hbm [resolvable:$true] %s322_s23 }
  0x39   : > { %928 = dma.hbm_to_vmem [thread:$0]  (!%p1396_p0), %s323_s23, 1024, %s325_s30, %s311_s1, %s1269_s18, %s1270_s29, %s1271_s28  }
  0x3a   : > { %s255_s20 = sshll.u32 %s253_s5, 4  ;;  %s345_s24 = scalar_lea.hbm %s1615_s4, %s1400_s6  ;;  %s256_s20 = int_to_ptr.hbm [resolvable:$true] %s255_s20 }
  0x3b   : > { %919 = dma.hbm_to_vmem [thread:$0]  (!%p1396_p0), %s256_s20, 128, %s258_s2, %s243_s25  }
  0x3c   : > { %925 = dma.hbm_to_vmem [thread:$0]  (!%p1396_p0), %s299_s16, 1024, %s1415_s12, %s1408_s7, %s1269_s18, %s1270_s29, %s1271_s28  }
  0x3d   : > { %s347_s23 = sshll.u32 %s345_s24, 4  ;;  %s338_s30 = scalar_lea.vmem [#allocation14], %s1390_s15  ;;  %s348_s23 = int_to_ptr.hbm [resolvable:$true] %s347_s23 }
  0x3e   : > { %s349_s21 = sshll.u32 %s338_s30, 4  ;;  %358 = sbr.rel (%p1419_p3) target bundleno = 133 (0x85), region = 40  ;;  %s350_s21 = int_to_ptr.vmem [resolvable:$true] %s349_s21 }
  0x3f   : > { %931 = dma.hbm_to_vmem [thread:$0]  (!%p1396_p0), %s348_s23, 128, %s350_s21, %s311_s1  }
  0x40   : > { %s1454_s13 = sand.u32 (!%p1419_p3), 1, %s1243_s19  }
  0x41   : > { %s1457_s2 = sshll.u32 (!%p1419_p3), %s1454_s13, 3  ;;  %s361_s3 = scalar_lea.sflag (!%p1419_p3), [#allocation7], %s1454_s13 }
  0x42   : > { %s364_s24 = scalar_lea.vmem (!%p1419_p3), [#allocation6], %s1457_s2 }
  0x43   : > { %1222 = dma.done.wait (%p1368_p8), %s361_s3, 128  }
  0x44   : > { %1224 = vsyncadd (%p1368_p8), %s361_s3, 4294967168  ;;  %s370_s21 = sand.u32 1, %s1344_s26   ;;  %s374_s15 = scalar_lea.vmem [#allocation9], %s1457_s2 }
  0x45   : > { %s371_s12 = scalar_lea.sflag [#allocation10], %s370_s21 }
  0x46   : > { %1226 = dma.done.wait (%p1368_p8), %s371_s12, 1152  }
  0x47   : > { %1228 = vsyncadd (%p1368_p8), %s371_s12, 4294966144  ;;  %s872_s27 = sshll.u32 %s1454_s13, 6  ;;  %s391_s7 = scalar_lea.sflag [#allocation13], %s370_s21 }
  0x48   : > { %s1472_s6 = scalar_lea.vmem [#allocation11], %s872_s27  ;;  %s1474_s11 = scalar_lea.vmem [#allocation12], %s872_s27 }
  0x49   : > { %1230 = dma.done.wait (%p1368_p8), %s391_s7, 1152  }
  0x4a   : > { %1232 = vsyncadd (%p1368_p8), %s391_s7, 4294966144  ;;  %v1272_v0 = vmov 0.0   ;;  %v1480_v1 = vld [vmem:[%s364_s24] sm:$0xff]  ;;  %v466_v2 = vld [vmem:[%s374_s15] sm:$0xff]  ;;  %s404_s26 = scalar_lea.vmem [#allocation14], %s1457_s2  ;;  %s1665_s8 = sld [smem:[#allocation22_spill]] }
  0x4b   : > { %462 = vst [vmem:[#allocation3] sm:$0x1] %v1272_v0  ;;  %v467_v3 = vld [vmem:[%s404_s26] sm:$0xff]  ;;  %v479_v4 = vadd.f32 %v466_v2, %v1480_v1  ;;  %vm582_vm0 = vcmp.ne.f32.partialorder %v1480_v1, 0.0  ;;  %v880_v11 = vld [vmem:[%s1472_s6 + $0x10] sm:$0xff]  ;;  %v1493_v12 = vmul.f32 %v466_v2, %v1480_v1  ;;  %v883_v16 = vld [vmem:[%s1472_s6 + $0x18] sm:$0xff] }
  0x4c   : > { %461 = vst [vmem:[#allocation2] sm:$0x1] %v1272_v0  ;;  %v488_v5 = vld [vmem:[%s1472_s6] sm:$0xff]  ;;  %v1487_v7 = vmul.f32 8.0, %v467_v3  ;;  %v877_v9 = vld [vmem:[%s1472_s6 + $0x8] sm:$0xff]  ;;  %v881_v15 = vld [vmem:[%s1474_s11 + $0x10] sm:$0xff] }
  0x4d   : > { %463 = vst [vmem:[#allocation4] sm:$0x1] %v1272_v0  ;;  %v489_v6 = vld [vmem:[%s1474_s11] sm:$0xff]  ;;  %v878_v10 = vld [vmem:[%s1474_s11 + $0x8] sm:$0xff]  ;;  %v480_v13 = vrot.slane %v479_v4, 4  ;;  %v884_v17 = vld [vmem:[%s1474_s11 + $0x18] sm:$0xff]  ;;  %v514_v21 = vsub.f32 %v880_v11, %v881_v15 }
  0x4e   : > { %464 = vst [vmem:[#allocation5] sm:$0x1] %v1272_v0  ;;  %v490_v8 = vsub.f32 %v488_v5, %v489_v6  ;;  %v502_v14 = vsub.f32 %v877_v9, %v878_v10  ;;  %1009 = vrcp.f32 %v1487_v7  ;;  %v1501_v18 = vsel %vm582_vm0, 1.0, %v1272_v0  ;;  %v886_v23 = vld [vmem:[%s1472_s6 + $0x20] sm:$0xff]  ;;  %v889_v49 = vld [vmem:[%s1472_s6 + $0x28] sm:$0xff]  ;;  %v892_v51 = vld [vmem:[%s1472_s6 + $0x30] sm:$0xff] }
  0x4f   : > { %v526_v22 = vsub.f32 %v883_v16, %v884_v17  ;;  %v887_v24 = vld [vmem:[%s1474_s11 + $0x20] sm:$0xff]  ;;  %v481_v25 = vadd.f32 %v480_v13, %v479_v4  ;;  %v515_v32 = vand.u32 2147483647, %v514_v21  ;;  %v517_v38 = vmul.f32 0.5, %v514_v21  ;;  %v890_v50 = vld [vmem:[%s1474_s11 + $0x28] sm:$0xff]  ;;  %v893_v56 = vld [vmem:[%s1474_s11 + $0x30] sm:$0xff] }
  0x50   : > { %v491_v19 = vand.u32 2147483647, %v490_v8  ;;  %v493_v20 = vmul.f32 0.5, %v490_v8  ;;  %v503_v26 = vand.u32 2147483647, %v502_v14  ;;  %v505_v27 = vmul.f32 0.5, %v502_v14 }
  0x51   : > { %v538_v28 = vsub.f32 %v886_v23, %v887_v24  ;;  %v482_v33 = vrot.slane %v481_v25, 2  ;;  %vm1511_vm3 = vcmp.lt.f32.partialorder %v515_v32, 1.0  ;;  %v882_v39 = vadd.f32 -0.5, %v515_v32  ;;  %v895_v57 = vld [vmem:[%s1472_s6 + $0x38] sm:$0xff]  ;;  %s900_s16 = sshll.u32 %s1255_s22, 1  ;;  %s1666_s9 = sld [smem:[#allocation34_spill]] }
  0x52   : > { %vm1505_vm1 = vcmp.lt.f32.partialorder %v491_v19, 1.0  ;;  %v494_v30 = vmul.f32 %v493_v20, %v490_v8  ;;  %v876_v31 = vadd.f32 -0.5, %v491_v19  ;;  %vm504_vm2 = vcmp.lt.f32.partialorder %v503_v26, 1.0  ;;  %v896_v58 = vld [vmem:[%s1474_s11 + $0x38] sm:$0xff]  ;;  %s656_s1 = sadd.s32 %s1665_s8, %s900_s16  ;;  %s451_s5 = scalar_lea.vmem [#allocation15], %s1457_s2 }
  0x53   : > { %v506_v34 = vmul.f32 %v505_v27, %v502_v14  ;;  %v879_v35 = vadd.f32 -0.5, %v503_v26  ;;  %v483_v41 = vadd.f32 %v482_v33, %v481_v25  ;;  %v527_v43 = vand.u32 2147483647, %v526_v22  ;;  %v478_v59 = vld [vmem:[#allocation3] sm:$0x1]  ;;  %s901_s18 = sshll.u32 %s656_s1, 3 }
  0x54   : > { %v496_v36 = vsel %vm1505_vm1, %v494_v30, %v876_v31  ;;  %v1515_v40 = vpop.eup %1009  ;;  %v529_v44 = vmul.f32 0.5, %v526_v22  ;;  %v518_v46 = vmul.f32 %v517_v38, %v514_v21  ;;  %v539_v47 = vand.u32 2147483647, %v538_v28  ;;  %v600_v1 = vld [vmem:[#allocation4] sm:$0x1]  ;;  %s660_s20 = sshll.u32 %s451_s5, 4  ;;  %s661_s20 = int_to_ptr.vmem [resolvable:$true] %s660_s20 }
  0x55   : > { %v508_v42 = vsel %vm504_vm2, %v506_v34, %v879_v35  ;;  %v541_v48 = vmul.f32 0.5, %v538_v28  ;;  %v484_v52 = vrot.slane %v483_v41, 1  ;;  %vm1520_vm4 = vcmp.lt.f32.partialorder %v527_v43, 1.0  ;;  %s646_s25 = scalar_lea.sflag [#allocation8], %s1454_s13 }
  0x56   : > { %v509_v45 = vadd.f32 %v508_v42, %v496_v36  ;;  %v530_v54 = vmul.f32 %v529_v44, %v526_v22  ;;  %v885_v55 = vadd.f32 -0.5, %v527_v43  ;;  %vm589_vm5 = vweird.f32 %v1487_v7 }
  0x57   : > { %v520_v60 = vsel %vm1511_vm3, %v518_v46, %v882_v39  ;;  %vm1530_vm6 = vcmp.lt.f32.partialorder %v539_v47, 1.0  ;;  %v542_v62 = vmul.f32 %v541_v48, %v538_v28  ;;  %v888_v63 = vadd.f32 -0.5, %v539_v47  ;;  %s658_s14 = scalar_lea.hbm %s1666_s9, %s901_s18  ;;  %s1181_s3 = scalar_lea.hbm %s1666_s9, 32 }
  0x58   : > { %v485_v0 = vadd.f32 %v484_v52, %v483_v41  ;;  %v521_v2 = vadd.f32 %v520_v60, %v509_v45  ;;  %v532_v3 = vsel %vm1520_vm4, %v530_v54, %v885_v55  ;;  %v550_v4 = vsub.f32 %v889_v49, %v890_v50  ;;  %v468_v55 = vld [vmem:[#allocation2] sm:$0x1]  ;;  %s662_s22 = sshll.u32 %s658_s14, 4  ;;  %s663_s22 = int_to_ptr.hbm [resolvable:$true] %s662_s22 }
  0x59   : > { %v544_v5 = vsel %vm1530_vm6, %v542_v62, %v888_v63  ;;  %v562_v6 = vsub.f32 %v892_v51, %v893_v56  ;;  %v574_v8 = vsub.f32 %v895_v57, %v896_v58  ;;  %v585_v9 = vmul.f32 %v1515_v40, %v1487_v7  ;;  %v609_v57 = vld [vmem:[#allocation5] sm:$0x1]  ;;  %s1175_s10 = sshra.s32 %s663_s22, 4  ;;  %s1176_s10 = int_to_ptr.hbm [resolvable:$true] %s1175_s10 }
  0x5a   : > { %v486_v10 = vadd.f32 %v485_v0, %v478_v59  ;;  %v533_v11 = vadd.f32 %v532_v3, %v521_v2  ;;  %v551_v13 = vand.u32 2147483647, %v550_v4  ;;  %v553_v14 = vmul.f32 0.5, %v550_v4  ;;  %s1177_s23 = scalar_lea.hbm %s1176_s10, 8  ;;  %p1182_p7 = scmp.lt.s32.totalorder %s1176_s10, %s1666_s9 }
  0x5b   : > { %v563_v15 = vand.u32 2147483647, %v562_v6  ;;  %v565_v16 = vmul.f32 0.5, %v562_v6  ;;  %v575_v17 = vand.u32 2147483647, %v574_v8  ;;  %v577_v19 = vmul.f32 0.5, %v574_v8  ;;  %p1178_p4 = scmp.ne.s32.totalorder %s1176_s10, %s1177_s23  ;;  %p1183_p8 = scmp.lt.s32.totalorder %s1181_s3, %s1177_s23 }
  0x5c   : > { %487 = vst [vmem:[#allocation3] sm:$0x1] %v486_v10  ;;  %v545_v20 = vadd.f32 %v544_v5, %v533_v11  ;;  %vm552_vm7 = vcmp.lt.f32.partialorder %v551_v13, 1.0  ;;  %v554_v21 = vmul.f32 %v553_v14, %v550_v4  ;;  %v891_v22 = vadd.f32 -0.5, %v551_v13 }
  0x5d   : > { %vm1540_vm8 = vcmp.lt.f32.partialorder %v563_v15, 1.0  ;;  %v566_v24 = vmul.f32 %v565_v16, %v562_v6  ;;  %v894_v25 = vadd.f32 -0.5, %v563_v15  ;;  %vm1544_vm9 = vcmp.lt.f32.partialorder %v575_v17, 1.0  ;;  %p1179_p5 = pnand %p1178_p4, %p1372_p9  ;;  %p1184_p10 = por %p1183_p8, %p1182_p7 }
  0x5e   : > { %v556_v27 = vsel %vm552_vm7, %v554_v21, %v891_v22  ;;  %v578_v28 = vmul.f32 %v577_v19, %v574_v8  ;;  %v897_v29 = vadd.f32 -0.5, %v575_v17  ;;  %v586_v30 = vsub.f32 1.0, %v585_v9 }
  0x5f   : > { %v557_v31 = vadd.f32 %v556_v27, %v545_v20  ;;  %v568_v32 = vsel %vm1540_vm8, %v566_v24, %v894_v25  ;;  %vm590_vm10 = vweird.f32 %v1515_v40  ;;  %v593_v33 = vand.u32 2147483647, %v1487_v7  ;;  %p1180_p6 = pneg %p1179_p5 }
  0x60   : > { %v580_v34 = vsel %vm1544_vm9, %v578_v28, %v897_v29  ;;  %v587_v35 = vmul.f32 %v1515_v40, %v586_v30  ;;  %v595_v36 = vand.u32 2147483648, %v1487_v7  ;;  %v470_v37 = vrot.slane %v1493_v12, 4  ;;  %vm591_vm11 = vmor %vm589_vm5, %vm590_vm10 }
  0x61   : > { %v569_v38 = vadd.f32 %v568_v32, %v557_v31  ;;  %v612_v39 = vrot.slane %v1501_v18, 4  ;;  %vm594_vm12 = vcmp.eq.f32.partialorder %v593_v33, 8.507059e+37  ;;  %vm636_vm13 = vcmask 1040384   ;;  %p1185_p11 = pnand %p1184_p10, %p1180_p6 }
  0x62   : > { %v588_v41 = vadd.f32 %v1515_v40, %v587_v35  ;;  %v596_v42 = vor.u32 1.1754944e-38, %v595_v36  ;;  %v471_v43 = vadd.f32 %v470_v37, %v1493_v12  ;;  %vm638_vm14 = vcmask 1041408  }
  0x63   : > { %v581_v44 = vadd.f32 %v580_v34, %v569_v38  ;;  %v613_v45 = vadd.f32 %v1501_v18, %v612_v39  ;;  %v1006_v2 = vld [vmem:[#allocation3] ss:$0 sm:$0xff]  ;;  %vm640_vm15 = vcmask 1042432  }
  0x64   : > { %v592_v46 = vsel %vm591_vm11, %v1515_v40, %v588_v41  ;;  %v472_v47 = vrot.slane %v471_v43, 2 }
  0x65   : > { %v597_v48 = vsel %vm594_vm12, %v596_v42, %v592_v46  ;;  %v614_v49 = vrot.slane %v613_v45, 2 }
  0x66   : > { %v598_v50 = vmul.f32 %v597_v48, %v581_v44  ;;  %v473_v51 = vadd.f32 %v472_v47, %v471_v43 }
  0x67   : > { %v615_v7 = vadd.f32 %v614_v49, %v613_v45 }
  0x68   : > { %v599_v52 = vsel %vm582_vm0, %v598_v50, 0.0  ;;  %v474_v53 = vrot.slane %v473_v51, 1  ;;  %vm642_vm0 = vcmask 1043456  }
  0x69   : > { %v601_v54 = vrot.slane %v599_v52, 4  ;;  %v616_v56 = vrot.slane %v615_v7, 1 }
  0x6a   : > { %v475_v12 = vadd.f32 %v474_v53, %v473_v51 }
  0x6b   : > { %v602_v18 = vadd.f32 %v601_v54, %v599_v52  ;;  %v617_v58 = vadd.f32 %v616_v56, %v615_v7 }
  0x6c   : > { %v476_v40 = vadd.f32 %v475_v12, %v468_v55 }
  0x6d   : > { %v603_v59 = vrot.slane %v602_v18, 2  ;;  %v618_v60 = vadd.f32 %v617_v58, %v609_v57 }
  0x6e   : > { %477 = vst [vmem:[#allocation2] sm:$0x1] %v476_v40 }
  0x6f   : > { %v604_v61 = vadd.f32 %v603_v59, %v602_v18  ;;  %619 = vst [vmem:[#allocation5] sm:$0x1] %v618_v60 }
  0x71   : > { %v605_v62 = vrot.slane %v604_v61, 1 }
  0x73   : > { %v606_v63 = vadd.f32 %v605_v62, %v604_v61 }
  0x75   : > { %v607_v0 = vadd.f32 %v606_v63, %v600_v1  ;;  %v623_v3 = vld [vmem:[#allocation2] sm:$0x1] }
  0x76   : > { %v1008_v4 = vld [vmem:[#allocation5] ss:$0 sm:$0xff]  ;;  %v637_v5 = vsel %vm636_vm13, %v623_v3, %v1006_v2 }
  0x77   : > { %608 = vst [vmem:[#allocation4] sm:$0x1] %v607_v0 }
  0x7e   : > { %v1007_v6 = vld [vmem:[#allocation4] ss:$0 sm:$0xff] }
  0x7f   : > { %v639_v8 = vsel %vm638_vm14, %v637_v5, %v1007_v6 }
  0x80   : > { %v641_v9 = vsel %vm640_vm15, %v639_v8, %v1008_v4 }
  0x81   : > { %v643_v10 = vsel %vm642_vm0, %v641_v9, 0.0 }
  0x82   : > { %644 = vst [vmem:[%s451_s5] sm:$0xff] %v643_v10 }
  0x83   : > { %1188 = shalt.err (!%p1185_p11)
}
  0x84   : > { %914 = dma.vmem_to_hbm [thread:$0]  (%p1372_p9), %s661_s20, 128, %s663_s22, %s646_s25  }
  0x85 PF: > { %s1668_s13 = sld [smem:[#allocation25_spill]] }
  0x86   : > { %s1669_s12 = sld [smem:[#allocation20_spill]] }
  0x8b   : > { %p937_p13 = scmp.ge.s32.totalorder %s1668_s13, 2 }
  0x8c   : > { %s674_s27 = sand.u32 1, %s1669_s12  }
  0x8d   : > { %p933_p0 = pnand %p937_p13, %p1378_p12  ;;  %s675_s6 = scalar_lea.sflag [#allocation8], %s674_s27 }
  0x8f   : > { %p934_p1 = pneg %p933_p0 }
  0x91   : > { %1234 = dma.done.wait (%p934_p1), %s675_s6, 128  }
  0x92   : > { %1236 = vsyncadd (%p934_p1), %s675_s6, 4294967168  ;;  %s27_s25 = sadd.s32 1, %s1668_s13   ;;  %s1671_s7 = sld [smem:[#allocation21_spill]] }
  0x93   : > { %p24_p2 = scmp.ge.s32.totalorder %s27_s25, 6   ;;  %s1672_s20 = sld [smem:[#allocation30_spill]] }
  0x94   : > { %s1673_s21 = sld [smem:[#allocation23_spill]]  ;;  %s1677_s18 = smov %s1243_s19 }
  0x95   : > { %s1674_s22 = sld [smem:[#allocation24_spill]]  ;;  %26 = sbr.rel (!%p24_p2) target bundleno = 16 (0x10), region = 155 }
  0x96   : > { %s1675_s23 = sld [smem:[#allocation26_spill]] }
  0x97   : > { %s1676_s24 = sld [smem:[#allocation27_spill]] }
  0x98   : > { %s1678_s19 = smov %s1671_s7 }
  0x9a   :  { %681 = vsyncpa [#allocation7], 1 }
  0x9b   :  { %683 = vsyncpa [#allocation7 + $0x1], 1 }
  0x9c   :  { %684 = vsyncpa [#allocation10], 1 }
  0x9d   :  { %686 = vsyncpa [#allocation10 + $0x1], 1 }
  0x9e   :  { %687 = vsyncpa [#allocation13], 1 }
  0x9f   :  { %689 = vsyncpa [#allocation13 + $0x1], 1 }
  0xa0   :  { %690 = vsyncpa [#allocation8], 1 }
  0xa1   :  { %692 = vsyncpa [#allocation8 + $0x1], 1 }

</bundles_post_ra>
